<compile_context>
chip_gen: v5e
topology: v5e:2x2
jax: 0.10.0
libtpu: 0.0.40
codegen_flags: <defaults>
</compile_context>

<pallas_src>
import jax
import jax.numpy as jnp
from jax.experimental import pallas as pl
from jax.experimental.pallas import tpu as pltpu


def _round_up(a, b):
    return (a + b - 1) // b * b


# --------------------------------------------------------------------------
# Pass 1: one-shot fold of the per-sub-module parameters.
#   wsum = sum_s W_s   (f32 accumulation, stored in compute dtype)
#   bsum = sum_s b_s   (f32)
# Grid (j, ki, s): j (N tiles) outermost, s (sub-modules) innermost so the
# output tiles stay resident across the reduction.
# --------------------------------------------------------------------------
def param_sum_kernel(w_ref, b_ref, wsum_ref, bsum_ref, wacc_ref):
    ki = pl.program_id(1)
    s = pl.program_id(2)
    last_s = pl.num_programs(2) - 1

    @pl.when(s == 0)
    def _():
        wacc_ref[...] = w_ref[...].astype(jnp.float32)

    @pl.when(s != 0)
    def _():
        wacc_ref[...] += w_ref[...].astype(jnp.float32)

    @pl.when(s == last_s)
    def _():
        wsum_ref[...] = wacc_ref[...].astype(wsum_ref.dtype)

    # Bias only varies with (j, s); accumulate it once per column tile.
    @pl.when((ki == 0) & (s == 0))
    def _():
        bsum_ref[...] = b_ref[...].astype(jnp.float32)

    @pl.when((ki == 0) & (s != 0))
    def _():
        bsum_ref[...] += b_ref[...].astype(jnp.float32)


# --------------------------------------------------------------------------
# Pass 2: canonical (i, j, k)-tiled matmul against the summed weight, bias
# added in the finalize step.
# --------------------------------------------------------------------------
def matmul_bias_kernel(x_ref, w_ref, b_ref, o_ref, acc_ref):
    k = pl.program_id(2)

    @pl.when(k == 0)
    def _():
        acc_ref[...] = jnp.zeros_like(acc_ref)

    acc_ref[...] += jnp.dot(x_ref[...], w_ref[...],
                            preferred_element_type=jnp.float32)

    @pl.when(k == pl.num_programs(2) - 1)
    def _():
        o_ref[...] = (acc_ref[...] + b_ref[...]).astype(o_ref.dtype)


def module_sum(x, weights, biases, *, tm=256, tn=256, tk=512):
    """x: (M, K); weights: (S, K, N); biases: (S, N) -> (M, N)."""
    M, K = x.shape
    S, K2, N = weights.shape
    assert K2 == K and biases.shape == (S, N)

    compute_dtype = x.dtype
    itemsize = jnp.dtype(compute_dtype).itemsize

    # Full-dim blocks when the dim fits one tile (no padding needed); otherwise
    # MXU/lane-aligned tiles (tm mult of 8, tn/tk mult of 128) with minimal
    # zero-padding of the remainder.
    if M <= tm:
        tm = M
    if N <= tn:
        tn = N
    if K <= tk:
        tk = K
    Mp = _round_up(M, tm)
    Np = _round_up(N, tn)
    Kp = _round_up(K, tk)

    xp = x if (Mp == M and Kp == K) else jnp.pad(x, ((0, Mp - M), (0, Kp - K)))
    wp = weights if (Kp == K and Np == N) else jnp.pad(
        weights, ((0, 0), (0, Kp - K), (0, Np - N)))
    bp = (biases if Np == N else jnp.pad(biases, ((0, 0), (0, Np - N))))
    bp = bp.reshape(S, 1, Np)

    n_i, n_j, n_k = Mp // tm, Np // tn, Kp // tk

    # ---------------- pass 1: parameter fold ----------------
    psum_vmem = (2 * (tk * tn + tn) * itemsize        # double-buffered W_s, b_s
                 + 2 * tk * tn * itemsize             # wsum out (double-buffered)
                 + 2 * tn * 4                         # bsum out
                 + tk * tn * 4)                       # f32 accumulator
    psum_cost = pl.CostEstimate(
        flops=S * Kp * Np,
        transcendentals=0,
        bytes_accessed=S * (Kp * Np + Np) * itemsize + Kp * Np * itemsize + Np * 4,
    )
    wsum, bsum = pl.pallas_call(
        param_sum_kernel,
        out_shape=(
            jax.ShapeDtypeStruct((Kp, Np), compute_dtype),
            jax.ShapeDtypeStruct((1, Np), jnp.float32),
        ),
        grid_spec=pltpu.PrefetchScalarGridSpec(
            num_scalar_prefetch=0,
            grid=(n_j, n_k, S),
            in_specs=[
                pl.BlockSpec((pl.Squeezed(), tk, tn), lambda j, ki, s: (s, ki, j)),
                pl.BlockSpec((pl.Squeezed(), 1, tn), lambda j, ki, s: (s, 0, j)),
            ],
            out_specs=(
                pl.BlockSpec((tk, tn), lambda j, ki, s: (ki, j)),
                pl.BlockSpec((1, tn), lambda j, ki, s: (0, j)),
            ),
            scratch_shapes=[pltpu.VMEM((tk, tn), jnp.float32)],
        ),
        compiler_params=pltpu.CompilerParams(
            dimension_semantics=("parallel", "arbitrary", "arbitrary"),
            vmem_limit_bytes=2 * psum_vmem + (4 << 20),
        ),
        cost_estimate=psum_cost,
    )(wp, bp)

    # ---------------- pass 2: tiled matmul + bias ----------------
    mm_vmem = (2 * (tm * tk + tk * tn) * itemsize     # double-buffered x, wsum
               + 2 * tn * 4                           # bsum
               + 2 * tm * tn * itemsize               # out (double-buffered)
               + tm * tn * 4)                         # f32 accumulator
    mm_cost = pl.CostEstimate(
        flops=2 * Mp * Np * Kp,
        transcendentals=0,
        bytes_accessed=(Mp * Kp + Kp * Np + Mp * Np) * itemsize + Np * 4,
    )
    out = pl.pallas_call(
        matmul_bias_kernel,
        out_shape=jax.ShapeDtypeStruct((Mp, Np), compute_dtype),
        grid_spec=pltpu.PrefetchScalarGridSpec(
            num_scalar_prefetch=0,
            grid=(n_i, n_j, n_k),
            in_specs=[
                pl.BlockSpec((tm, tk), lambda i, j, k: (i, k)),
                pl.BlockSpec((tk, tn), lambda i, j, k: (k, j)),
                pl.BlockSpec((1, tn), lambda i, j, k: (0, j)),
            ],
            out_specs=pl.BlockSpec((tm, tn), lambda i, j, k: (i, j)),
            scratch_shapes=[pltpu.VMEM((tm, tn), jnp.float32)],
        ),
        compiler_params=pltpu.CompilerParams(
            dimension_semantics=("parallel", "parallel", "arbitrary"),
            vmem_limit_bytes=2 * mm_vmem + (4 << 20),
        ),
        cost_estimate=mm_cost,
    )(xp, wsum, bsum)

    return out[:M, :N]


if __name__ == "__main__":
    key = jax.random.PRNGKey(0)
    batch, seq, hidden = 2, 8, 32
    num_sub_modules = 3

    kx, kw, kb = jax.random.split(key, 3)
    x = jax.random.normal(kx, (batch, seq, hidden), dtype=jnp.float32)
    # Deterministic parameter init for each sub-module (Linear(hidden, hidden)).
    weights = 0.05 * jax.random.normal(
        kw, (num_sub_modules, hidden, hidden), dtype=jnp.float32
    )
    biases = 0.05 * jax.random.normal(
        kb, (num_sub_modules, hidden), dtype=jnp.float32
    )

    x2d = x.reshape(batch * seq, hidden)
    out = module_sum(x2d, weights, biases)
    out = jax.block_until_ready(out).reshape(batch, seq, hidden)

    # Pure-JAX reference of ModuleSum over the Linear sub-modules.
    ref = sum(
        jnp.einsum("bsk,kn->bsn", x, weights[i]) + biases[i]
        for i in range(num_sub_modules)
    )

    assert out.shape == (batch, seq, hidden)
    assert jnp.allclose(out, ref, atol=1e-4, rtol=1e-4)
    print("KERNEL_OK")
</pallas_src>

<mosaic_0001>
module attributes {stable_mosaic.version = 11 : i64} {
  func.func @param_sum_kernel(%arg0: i32, %arg1: i32, %arg2: i32, %arg3: memref<1x32x32xf32, #tpu.memory_space<vmem>>, %arg4: memref<1x1x32xf32, #tpu.memory_space<vmem>>, %arg5: memref<32x32xf32, #tpu.memory_space<vmem>>, %arg6: memref<1x32xf32, #tpu.memory_space<vmem>>, %arg7: memref<32x32xf32, #tpu.memory_space<vmem>>) attributes {dimension_semantics = [#tpu.dimension_semantics<parallel>, #tpu.dimension_semantics<arbitrary>, #tpu.dimension_semantics<arbitrary>], iteration_bounds = array<i64: 1, 1, 3>, scalar_prefetch = 0 : i64, scratch_operands = 1 : i64, tpu.core_type = #tpu.core_type<tc>, window_params = [{transform_indices = @transform_0, window_bounds = array<i64: 1, 32, 32>}, {transform_indices = @transform_1, window_bounds = array<i64: 1, 1, 32>}, {transform_indices = @transform_2, window_bounds = array<i64: 32, 32>}, {transform_indices = @transform_3, window_bounds = array<i64: 1, 32>}]} {
    %c0_i32 = arith.constant 0 : i32
    %0 = arith.cmpi eq, %arg2, %c0_i32 : i32
    %1 = arith.extui %0 : i1 to i32
    %c0_i32_0 = arith.constant 0 : i32
    %2 = arith.cmpi ne, %1, %c0_i32_0 : i32
    scf.if %2 {
      %c0 = arith.constant 0 : index
      %c0_10 = arith.constant 0 : index
      %c0_11 = arith.constant 0 : index
      %19 = vector.load %arg3[%c0, %c0_10, %c0_11] : memref<1x32x32xf32, #tpu.memory_space<vmem>>, vector<1x32x32xf32>
      %20 = vector.shape_cast %19 : vector<1x32x32xf32> to vector<32x32xf32>
      %c0_12 = arith.constant 0 : index
      %c0_13 = arith.constant 0 : index
      %21 = vector.load %arg7[%c0_12, %c0_13] : memref<32x32xf32, #tpu.memory_space<vmem>>, vector<32x32xf32>
      tpu.vector_store %arg7[%c0_12, %c0_13], %20 {strides = array<i32>} : memref<32x32xf32, #tpu.memory_space<vmem>>, vector<32x32xf32>,
    } else {
    }
    %c0_i32_1 = arith.constant 0 : i32
    %3 = arith.cmpi ne, %arg2, %c0_i32_1 : i32
    %4 = arith.extui %3 : i1 to i32
    %c0_i32_2 = arith.constant 0 : i32
    %5 = arith.cmpi ne, %4, %c0_i32_2 : i32
    scf.if %5 {
      %c0 = arith.constant 0 : index
      %c0_10 = arith.constant 0 : index
      %19 = vector.load %arg7[%c0, %c0_10] : memref<32x32xf32, #tpu.memory_space<vmem>>, vector<32x32xf32>
      %c0_11 = arith.constant 0 : index
      %c0_12 = arith.constant 0 : index
      %c0_13 = arith.constant 0 : index
      %20 = vector.load %arg3[%c0_11, %c0_12, %c0_13] : memref<1x32x32xf32, #tpu.memory_space<vmem>>, vector<1x32x32xf32>
      %21 = vector.shape_cast %20 : vector<1x32x32xf32> to vector<32x32xf32>
      %22 = arith.addf %19, %21 : vector<32x32xf32>
      %c0_14 = arith.constant 0 : index
      %c0_15 = arith.constant 0 : index
      %23 = vector.load %arg7[%c0_14, %c0_15] : memref<32x32xf32, #tpu.memory_space<vmem>>, vector<32x32xf32>
      tpu.vector_store %arg7[%c0_14, %c0_15], %22 {strides = array<i32>} : memref<32x32xf32, #tpu.memory_space<vmem>>, vector<32x32xf32>,
    } else {
    }
    %c2_i32 = arith.constant 2 : i32
    %6 = arith.cmpi eq, %arg2, %c2_i32 : i32
    %7 = arith.extui %6 : i1 to i32
    %c0_i32_3 = arith.constant 0 : i32
    %8 = arith.cmpi ne, %7, %c0_i32_3 : i32
    scf.if %8 {
      %c0 = arith.constant 0 : index
      %c0_10 = arith.constant 0 : index
      %19 = vector.load %arg7[%c0, %c0_10] : memref<32x32xf32, #tpu.memory_space<vmem>>, vector<32x32xf32>
      %c0_11 = arith.constant 0 : index
      %c0_12 = arith.constant 0 : index
      %20 = vector.load %arg5[%c0_11, %c0_12] : memref<32x32xf32, #tpu.memory_space<vmem>>, vector<32x32xf32>
      tpu.vector_store %arg5[%c0_11, %c0_12], %19 {strides = array<i32>} : memref<32x32xf32, #tpu.memory_space<vmem>>, vector<32x32xf32>,
    } else {
    }
    %c0_i32_4 = arith.constant 0 : i32
    %9 = arith.cmpi eq, %arg1, %c0_i32_4 : i32
    %c0_i32_5 = arith.constant 0 : i32
    %10 = arith.cmpi eq, %arg2, %c0_i32_5 : i32
    %11 = arith.andi %9, %10 : i1
    %12 = arith.extui %11 : i1 to i32
    %c0_i32_6 = arith.constant 0 : i32
    %13 = arith.cmpi ne, %12, %c0_i32_6 : i32
    scf.if %13 {
      %c0 = arith.constant 0 : index
      %c0_10 = arith.constant 0 : index
      %c0_11 = arith.constant 0 : index
      %19 = vector.load %arg4[%c0, %c0_10, %c0_11] : memref<1x1x32xf32, #tpu.memory_space<vmem>>, vector<1x1x32xf32>
      %20 = vector.shape_cast %19 : vector<1x1x32xf32> to vector<1x32xf32>
      %c0_12 = arith.constant 0 : index
      %c0_13 = arith.constant 0 : index
      %21 = vector.load %arg6[%c0_12, %c0_13] : memref<1x32xf32, #tpu.memory_space<vmem>>, vector<1x32xf32>
      tpu.vector_store %arg6[%c0_12, %c0_13], %20 {strides = array<i32>} : memref<1x32xf32, #tpu.memory_space<vmem>>, vector<1x32xf32>,
    } else {
    }
    %c0_i32_7 = arith.constant 0 : i32
    %14 = arith.cmpi eq, %arg1, %c0_i32_7 : i32
    %c0_i32_8 = arith.constant 0 : i32
    %15 = arith.cmpi ne, %arg2, %c0_i32_8 : i32
    %16 = arith.andi %14, %15 : i1
    %17 = arith.extui %16 : i1 to i32
    %c0_i32_9 = arith.constant 0 : i32
    %18 = arith.cmpi ne, %17, %c0_i32_9 : i32
    scf.if %18 {
      %c0 = arith.constant 0 : index
      %c0_10 = arith.constant 0 : index
      %19 = vector.load %arg6[%c0, %c0_10] : memref<1x32xf32, #tpu.memory_space<vmem>>, vector<1x32xf32>
      %c0_11 = arith.constant 0 : index
      %c0_12 = arith.constant 0 : index
      %c0_13 = arith.constant 0 : index
      %20 = vector.load %arg4[%c0_11, %c0_12, %c0_13] : memref<1x1x32xf32, #tpu.memory_space<vmem>>, vector<1x1x32xf32>
      %21 = vector.shape_cast %20 : vector<1x1x32xf32> to vector<1x32xf32>
      %22 = arith.addf %19, %21 : vector<1x32xf32>
      %c0_14 = arith.constant 0 : index
      %c0_15 = arith.constant 0 : index
      %23 = vector.load %arg6[%c0_14, %c0_15] : memref<1x32xf32, #tpu.memory_space<vmem>>, vector<1x32xf32>
      tpu.vector_store %arg6[%c0_14, %c0_15], %22 {strides = array<i32>} : memref<1x32xf32, #tpu.memory_space<vmem>>, vector<1x32xf32>,
    } else {
    }
    return
  }
  func.func @transform_0(%arg0: i32, %arg1: i32, %arg2: i32) -> (i32, i32, i32) {
    %c0_i32 = arith.constant 0 : i32
    return %arg2, %arg1, %arg0 : i32, i32, i32
  }
  func.func @transform_1(%arg0: i32, %arg1: i32, %arg2: i32) -> (i32, i32, i32) {
    %c0_i32 = arith.constant 0 : i32
    %c0_i32_0 = arith.constant 0 : i32
    return %arg2, %c0_i32, %arg0 : i32, i32, i32
  }
  func.func @transform_2(%arg0: i32, %arg1: i32, %arg2: i32) -> (i32, i32) {
    %c0_i32 = arith.constant 0 : i32
    return %arg1, %arg0 : i32, i32
  }
  func.func @transform_3(%arg0: i32, %arg1: i32, %arg2: i32) -> (i32, i32) {
    %c0_i32 = arith.constant 0 : i32
    %c0_i32_0 = arith.constant 0 : i32
    return %c0_i32, %arg0 : i32, i32
  }
}

</mosaic_0001>

<bundles_post_ra>
// kernel: tpu_custom_call.1
= control target key start
LH: loop header
LB: loop body
LE: loop exit
PB: predicated region body
PF: predicated region fallthrough
CT: control target
= control target key end

     0   :  { %9 = vsyncpa [#allocation4], 0  ;;  %s913_s0 = inlined_call_operand.hbm [shape: f32[3,32,32], index: 0, kind: input, shape index: {}]   ;;  %s914_s1 = inlined_call_operand.hbm [shape: f32[3,1,32], index: 1, kind: input, shape index: {}]   ;;  %s915_s2 = inlined_call_operand.hbm [shape: f32[32,32], index: 2, kind: output, shape index: {0}]   ;;  %s916_s3 = inlined_call_operand.hbm [shape: f32[1,32], index: 3, kind: output, shape index: {1}]  }
   0x1   :  { %11 = vsyncpa [#allocation4 + $0x1], 0 }
   0x2   :  { %12 = vsyncpa [#allocation7], 0 }
   0x3   :  { %14 = vsyncpa [#allocation7 + $0x1], 0 }
   0x4   :  { %15 = vsyncpa [#allocation5], 0 }
   0x5   :  { %16 = vsyncpa [#allocation10], 0  ;;  %s757_s12 = smov 0   ;;  %s759_s13 = smov 0  }
   0x6   :  { %s761_s14 = smov 0   ;;  %s763_s15 = smov 0  }
   0x7   :  { %s765_s16 = smov 0   ;;  %s767_s17 = smov 0  }
   0x8 LB: > { %s451_s18 = sadd.s32 4294967295, %s729_s17   ;;  %s34_s19 = sadd.s32 1, %s725_s16  ;;  %s729_s17 = sphi %s767_s17, %s22_s17   ;;  %s725_s16 = sphi %s765_s16, %s925_s16   ;;  %s721_s15 = sphi %s763_s15, %s924_s15   ;;  %s717_s14 = sphi %s761_s14, %s923_s14   ;;  %s713_s13 = sphi %s759_s13, %s922_s13   ;;  %s709_s12 = sphi %s757_s12, %s921_s12  }
   0x9   : > { %p35_p0 = scmp.ge.s32.totalorder %s34_s19, 3  ;;  %s52_s20 = sadd.s32 1, %s717_s14 }
   0xa   : > { %p59_p1 = scmp.ne.s32.totalorder %s717_s14, %s713_s13  ;;  %p60_p2 = scmp.eq.s32.totalorder %s729_s17, 0 }
   0xb   : > { %s927_s19 = smov (%p35_p0, %s34_s19), 0  ;;  %p65_p4 = scmp.ne.s32.totalorder %s713_s13, %s709_s12 }
   0xc   : > { %p793_p3 = por %p60_p2, %p59_p1  ;;  %s45_s22 = ssub.s32 %s725_s16, %s927_s19 }
   0xd   : > { %p66_p5 = scmp.eq.s32.totalorder %s451_s18, 0  ;;  %p50_p6 = scmp.eq.s32.totalorder %s45_s22, 0 }
   0xe   : > { %p492_p8 = scmp.lt.s32.totalorder %s729_s17, 3  ;;  %s171_s25 = sand.u32 1, %s717_s14  }
   0xf   : > { %p802_p7 = por %p66_p5, %p65_p4  ;;  %s470_s26 = sshll.u32 %s725_s16, 5 }
  0x10   : > { %s808_s24 = scalar_select %p50_p6, %s717_s14, %s52_s20  }
  0x11   : > { %s454_s27 = sshll.u32 %s171_s25, 5  ;;  %s183_s30 = scalar_lea.hbm %s913_s0, %s470_s26 }
  0x12   : > { %s184_s4 = sshll.u32 %s183_s30, 4  ;;  %s175_s5 = scalar_lea.vmem [#allocation3], %s454_s27  ;;  %s185_s4 = int_to_ptr.hbm [resolvable:$true] %s184_s4 }
  0x13   : > { %s186_s6 = sshll.u32 %s175_s5, 4  ;;  %p817_p9 = pnand %p492_p8, %p793_p3  ;;  %s187_s6 = int_to_ptr.vmem [resolvable:$true] %s186_s6 }
  0x14   : > { %p457_p10 = scmp.ge.s32.totalorder %s729_s17, 1  ;;  %p212_p11 = scmp.lt.s32.totalorder %s729_s17, 4 }
  0x15   : > { %s172_s8 = scalar_lea.sflag [#allocation4], %s171_s25  ;;  %s731_s9 = smov 128  }
  0x16   : > { %s732_s10 = smov 8   ;;  %p213_p12 = pnand %p457_p10, %p212_p11 }
  0x17   : > { %488 = dma.hbm_to_vmem [thread:$0]  (!%p817_p9), %s185_s4, 512, %s187_s6, %s172_s8, %s731_s9, %s731_s9, %s732_s10  }
  0x18   : > { %s203_s20 = scalar_lea.hbm %s914_s1, %s725_s16  ;;  %s199_s21 = scalar_lea.vmem [#allocation6], %s171_s25 }
  0x19   : > { %s205_s22 = sshll.u32 %s203_s20, 4  ;;  %s207_s26 = sshll.u32 %s199_s21, 4  ;;  %s206_s22 = int_to_ptr.hbm [resolvable:$true] %s205_s22  ;;  %s208_s26 = int_to_ptr.vmem [resolvable:$true] %s207_s26 }
  0x1a   : > { %s197_s27 = scalar_lea.sflag [#allocation7], %s171_s25  ;;  %216 = sbr.rel (%p213_p12) target bundleno = 94 (0x5e), region = 28 }
  0x1b   : > { %491 = dma.hbm_to_vmem [thread:$0]  (!%p817_p9), %s206_s22, 16, %s208_s26, %s197_s27  }
  0x1c   : > { %s832_s28 = sand.u32 (!%p213_p12), 1, %s713_s13  }
  0x1d   : > { %s458_s29 = sshll.u32 (!%p213_p12), %s832_s28, 5  ;;  %s219_s30 = scalar_lea.sflag (!%p213_p12), [#allocation4], %s832_s28 }
  0x1e   : > { %s836_s4 = scalar_lea.vmem (!%p213_p12), [#allocation3], %s458_s29 }
  0x1f   : > { %692 = dma.done.wait (%p802_p7), %s219_s30, 512  }
  0x20   : > { %694 = vsyncadd (%p802_p7), %s219_s30, 4294966784  ;;  %s229_s25 = scalar_lea.sflag [#allocation7], %s832_s28  ;;  %s231_s5 = scalar_lea.vmem [#allocation6], %s832_s28 }
  0x21   : > { %696 = dma.done.wait (%p802_p7), %s229_s25, 16  }
  0x22   : > { %698 = vsyncadd (%p802_p7), %s229_s25, 4294967280  ;;  %p256_p13 = scmp.eq.s32.totalorder %s721_s15, 0  ;;  %p459_p0 = scmp.ne.s32.totalorder %s721_s15, 0 }
  0x24   : > { %259 = sbr.rel (%p459_p0) target bundleno = 46 (0x2e), region = 40 }
  0x29   : > { %v260_v0 = vld [vmem:[%s836_s4] sm:$0xff]  ;;  %vm264_vm0 = vcmask 261120   ;;  %v261_v1 = vld [vmem:[%s836_s4 + $0x8] sm:$0xff]  ;;  %v262_v2 = vld [vmem:[%s836_s4 + $0x10] sm:$0xff] }
  0x2a   : > { %265 = vst.msk [vmem:[#allocation2] sm:$0xff] %vm264_vm0, %v260_v0  ;;  %v263_v3 = vld [vmem:[%s836_s4 + $0x18] sm:$0xff] }
  0x2b   : > { %266 = vst.msk [vmem:[#allocation2 + $0x8] sm:$0xff] %vm264_vm0, %v261_v1 }
  0x2c   : > { %267 = vst.msk [vmem:[#allocation2 + $0x10] sm:$0xff] %vm264_vm0, %v262_v2 }
  0x2d   : > { %268 = vst.msk [vmem:[#allocation2 + $0x18] sm:$0xff] %vm264_vm0, %v263_v3 }
  0x2e PF: > { %272 = sbr.rel (%p256_p13) target bundleno = 59 (0x3b), region = 44 }
  0x33   : > { %v273_v4 = vld [vmem:[#allocation2] sm:$0xff]  ;;  %vm285_vm1 = vcmask 261120   ;;  %v274_v6 = vld [vmem:[#allocation2 + $0x8] sm:$0xff]  ;;  %v275_v9 = vld [vmem:[#allocation2 + $0x10] sm:$0xff] }
  0x34   : > { %v277_v5 = vld [vmem:[%s836_s4] sm:$0xff]  ;;  %v278_v8 = vld [vmem:[%s836_s4 + $0x8] sm:$0xff]  ;;  %v279_v10 = vld [vmem:[%s836_s4 + $0x10] sm:$0xff] }
  0x35   : > { %v281_v7 = vadd.f32 %v277_v5, %v273_v4  ;;  %v282_v11 = vadd.f32 %v278_v8, %v274_v6  ;;  %v283_v12 = vadd.f32 %v279_v10, %v275_v9  ;;  %v276_v13 = vld [vmem:[#allocation2 + $0x18] sm:$0xff] }
  0x36   : > { %v280_v14 = vld [vmem:[%s836_s4 + $0x18] sm:$0xff] }
  0x37   : > { %286 = vst.msk [vmem:[#allocation2] sm:$0xff] %vm285_vm1, %v281_v7  ;;  %v284_v15 = vadd.f32 %v280_v14, %v276_v13 }
  0x38   : > { %287 = vst.msk [vmem:[#allocation2 + $0x8] sm:$0xff] %vm285_vm1, %v282_v11 }
  0x39   : > { %288 = vst.msk [vmem:[#allocation2 + $0x10] sm:$0xff] %vm285_vm1, %v283_v12 }
  0x3a   : > { %289 = vst.msk [vmem:[#allocation2 + $0x18] sm:$0xff] %vm285_vm1, %v284_v15 }
  0x3b PF: > { %p461_p1 = scmp.ne.s32.totalorder %s721_s15, 2 }
  0x3d   : > { %293 = sbr.rel (%p461_p1) target bundleno = 71 (0x47), region = 48 }
  0x42   : > { %v294_v16 = vld [vmem:[#allocation2] sm:$0xff]  ;;  %vm298_vm2 = vcmask 261120   ;;  %v295_v17 = vld [vmem:[#allocation2 + $0x8] sm:$0xff]  ;;  %v296_v18 = vld [vmem:[#allocation2 + $0x10] sm:$0xff] }
  0x43   : > { %299 = vst.msk [vmem:[#allocation8] sm:$0xff] %vm298_vm2, %v294_v16  ;;  %v297_v19 = vld [vmem:[#allocation2 + $0x18] sm:$0xff] }
  0x44   : > { %300 = vst.msk [vmem:[#allocation8 + $0x8] sm:$0xff] %vm298_vm2, %v295_v17 }
  0x45   : > { %301 = vst.msk [vmem:[#allocation8 + $0x10] sm:$0xff] %vm298_vm2, %v296_v18 }
  0x46   : > { %302 = vst.msk [vmem:[#allocation8 + $0x18] sm:$0xff] %vm298_vm2, %v297_v19 }
  0x47 PF: > { %307 = sbr.rel (!%p256_p13) target bundleno = 76 (0x4c), region = 52  ;;  %v308_v20 = vld [vmem:[%s231_s5] sm:$0x1] (%p256_p13)  ;;  %vm309_vm3 = vcmask (%p256_p13), 253952  }
  0x48   : > { %310 = vst.msk [vmem:[#allocation9] sm:$0x1] (%p256_p13), %vm309_vm3, %v308_v20 }
  0x4c PF: > { %314 = sbr.rel (!%p459_p0) target bundleno = 83 (0x53), region = 56  ;;  %v316_v22 = vld [vmem:[%s231_s5] sm:$0x1] (%p459_p0)  ;;  %vm318_vm4 = vcmask (%p459_p0), 253952  }
  0x4f   : > { %v315_v21 = vld [vmem:[#allocation9] sm:$0x1] (%p459_p0) }
  0x50   : > { %v317_v23 = vadd.f32 (%p459_p0), %v316_v22, %v315_v21 }
  0x52   : > { %319 = vst.msk [vmem:[#allocation9] sm:$0x1] %vm318_vm4, %v317_v23 }
  0x53 PF: > { %p873_p2 = scmp.eq.s32.totalorder %s451_s18, 2  ;;  %s331_s15 = sshll.u32 %s915_s2, 4  ;;  %s332_s15 = int_to_ptr.hbm [resolvable:$true] %s331_s15 }
  0x54   : > { %s733_s8 = smov [#allocation8]   ;;  %s734_s10 = smov 128  }
  0x55   : > { %s329_s9 = sshll.u32 %s733_s8, 4  ;;  %s735_s11 = smov 8   ;;  %s330_s9 = int_to_ptr.vmem [resolvable:$true] %s329_s9 }
  0x56   : > { %478 = dma.vmem_to_hbm [thread:$0]  (%p873_p2), %s330_s9, 512, %s332_s15, [#allocation5], %s734_s10, %s734_s10, %s735_s11  }
  0x57   : > { %s736_s12 = smov [#allocation9]   ;;  %s347_s21 = sshll.u32 %s916_s3, 4  ;;  %s348_s21 = int_to_ptr.hbm [resolvable:$true] %s347_s21 }
  0x58   : > { %s345_s18 = sshll.u32 %s736_s12, 4  ;;  %s346_s18 = int_to_ptr.vmem [resolvable:$true] %s345_s18 }
  0x59   : > { %480 = dma.vmem_to_hbm [thread:$0]  (%p873_p2), %s346_s18, 16, %s348_s21, [#allocation10]  }
  0x5a   : > { %700 = dma.done.wait (%p873_p2), [#allocation5], 512  }
  0x5b   : > { %702 = vsyncadd (%p873_p2), [#allocation5], 4294966784 }
  0x5c   : > { %704 = dma.done.wait (%p873_p2), [#allocation10], 16  }
  0x5d   : > { %706 = vsyncadd (%p873_p2), [#allocation10], 4294967280 }
  0x5e PF: > { %s22_s17 = sadd.s32 1, %s729_s17   ;;  %s921_s12 = smov %s713_s13 }
  0x5f   : > { %p19_p3 = scmp.ge.s32.totalorder %s22_s17, 5   ;;  %s922_s13 = smov %s717_s14 }
  0x60   : > { %s923_s14 = smov %s808_s24  ;;  %s924_s15 = smov %s725_s16 }
  0x61   : > { %s925_s16 = smov %s927_s19  ;;  %21 = sbr.rel (!%p19_p3) target bundleno = 8 (0x8), region = 108 }
  0x66   :  { %366 = vsyncpa [#allocation4], 1 }
  0x67   :  { %368 = vsyncpa [#allocation4 + $0x1], 1 }
  0x68   :  { %369 = vsyncpa [#allocation7], 1 }
  0x69   :  { %371 = vsyncpa [#allocation7 + $0x1], 1 }
  0x6a   :  { %372 = vsyncpa [#allocation5], 1 }
  0x6b   :  { %374 = vsyncpa [#allocation5 + $0x1], 1 }
  0x6c   :  { %375 = vsyncpa [#allocation10], 1 }

</bundles_post_ra>
